<compile_context>
chip_gen: v7x
topology: tpu7x:2x2x1
jax: 0.10.0
libtpu: 0.0.40
codegen_flags: <defaults>
</compile_context>

<pallas_src>
import functools

import jax
import jax.numpy as jnp
from jax import lax
from jax.experimental import pallas as pl
from jax.experimental.pallas import tpu as pltpu

EPS = 1e-5
NEG_SLOPE = 0.2
K = 4  # kernel_size of the Conv2d


def _block_kernel(x_ref, w_ref, o_ref, *, stride, h_out, w_out, c_in):
    """One grid step == (one sample) x (one Cout tile).

    x_ref: (s*s, Cin, Hq, Wq)  bf16 phase-decomposed reflect-padded input,
           channel-major / spatial-last (lane-dense):
             x_ref[ph*s + pw, c, i, j] == x_pad[n, c, ph + s*i, pw + s*j]
    w_ref: (Ct, K*K*Cin)       bf16 weights, w_ref[co, (kh*K+kw)*Cin + ci] = W[co, ci, kh, kw]
    o_ref: (1, Ct, P)          f32 output tile, P = Hout*Wout (NCHW order, lane-dense)
    """
    p = h_out * w_out

    # Fused im2col with folded taps: gather the 16 shifted tap windows along a
    # leading (untiled) axis, then do a single collapse of (h_out, w_out) -> P.
    taps = []
    for kh in range(K):
        i0, ph = kh // stride, kh % stride
        for kw in range(K):
            j0, pw = kw // stride, kw % stride
            taps.append(x_ref[ph * stride + pw, :, i0:i0 + h_out, j0:j0 + w_out])
    rhs = jnp.concatenate(taps, axis=0).reshape(K * K * c_in, p)   # (K*K*Cin, P) bf16

    # One MXU matmul, contraction depth K*K*Cin, result already (Cout_tile, P).
    # (No bias add: it cancels exactly under InstanceNorm2d(affine=False).)
    y = jnp.dot(w_ref[...], rhs, preferred_element_type=jnp.float32)

    # InstanceNorm2d: per-(sample, channel) stats over the P lane axis, biased
    # variance, eps=1e-5, no affine.  Centered two-pass form kept for numerics.
    mean = jnp.mean(y, axis=1, keepdims=True)                      # (Ct, 1)
    centered = y - mean
    var = jnp.mean(centered * centered, axis=1, keepdims=True)
    yn = centered * lax.rsqrt(var + EPS)

    # LeakyReLU(0.2); lane-dense store along P.
    o_ref[0] = jnp.where(yn >= 0, yn, NEG_SLOPE * yn).astype(o_ref.dtype)


@functools.partial(jax.jit, static_argnames=("stride",))
def block_forward(x, weight, bias, *, stride):
    """x: (N, Cin, H, W) NCHW f32; weight: (Cout, Cin, 4, 4); bias: (Cout,)."""
    del bias  # cancels exactly under InstanceNorm2d(affine=False); see header comment
    n, c_in, h, w = x.shape
    c_out = weight.shape[0]

    h_out = (h + 2 - K) // stride + 1
    w_out = (w + 2 - K) // stride + 1
    p = h_out * w_out
    assert h_out >= 1 and w_out >= 1

    # padding=1 with padding_mode='reflect' (stay NCHW: channel-major, spatial last).
    x_pad = jnp.pad(x, ((0, 0), (0, 0), (1, 1), (1, 1)), mode="reflect")
    hp, wp = h + 2, w + 2

    # Stride-phase decomposition so the kernel only needs contiguous slices:
    #   x_ph[n*s*s + ph*s + pw, c, i, j] = x_pad[n, c, ph + s*i, pw + s*j]
    hq = -(-hp // stride)
    wq = -(-wp // stride)
    # Cheap guards: every tap window must stay inside the phase planes.
    assert (K - 1) // stride + h_out <= hq, "phase-decomposition height bound violated"
    assert (K - 1) // stride + w_out <= wq, "phase-decomposition width bound violated"

    x_pp = jnp.pad(x_pad, ((0, 0), (0, 0), (0, hq * stride - hp),
                           (0, wq * stride - wp)))
    x_ph = x_pp.reshape(n, c_in, hq, stride, wq, stride)
    x_ph = x_ph.transpose(0, 3, 5, 1, 2, 4)                      # (N, s, s, Cin, Hq, Wq)
    x_ph = x_ph.reshape(n * stride * stride, c_in, hq, wq).astype(jnp.bfloat16)

    # Weights as a single (Cout, K*K*Cin) matrix matching the in-kernel rhs row
    # order (kh, kw, ci):  w_mat[co, (kh*K+kw)*Cin + ci] = W[co, ci, kh, kw]
    ck = K * K * c_in
    w_mat = weight.transpose(0, 2, 3, 1).reshape(c_out, ck).astype(jnp.bfloat16)

    # Cout tiling (second parallel grid axis).  For small Cout this is 1 tile.
    if c_out > 128 and c_out % 128 == 0:
        c_tile = 128
    else:
        c_tile = c_out
    n_ct = c_out // c_tile

    # VMEM budget from the chosen block sizes, with headroom below physical VMEM.
    block_bytes = (
        2 * (stride * stride * hq * wq * c_in * 2)   # bf16 input block, 2 buffers
        + 2 * (c_tile * ck * 2)                      # bf16 weight tile, 2 buffers
        + 2 * (c_tile * p * 4)                       # f32 output tile, 2 buffers
        + ck * p * 2                                 # bf16 patch matrix
        + 4 * (c_tile * p * 4)                       # f32 matmul result + temporaries
    )
    try:
        vmem_cap = int(pltpu.get_tpu_info().vmem_capacity_bytes)
    except Exception:
        vmem_cap = 64 << 20
    vmem_limit = int(min(int(0.85 * vmem_cap), max(32 << 20, 4 * block_bytes)))

    out = pl.pallas_call(
        functools.partial(_block_kernel, stride=stride,
                          h_out=h_out, w_out=w_out, c_in=c_in),
        out_shape=jax.ShapeDtypeStruct((n, c_out, p), jnp.float32),
        grid_spec=pltpu.PrefetchScalarGridSpec(
            num_scalar_prefetch=0,
            grid=(n, n_ct),
            in_specs=[
                pl.BlockSpec((stride * stride, c_in, hq, wq),
                             lambda i, j: (i, 0, 0, 0)),
                pl.BlockSpec((c_tile, ck), lambda i, j: (j, 0)),
            ],
            out_specs=pl.BlockSpec((1, c_tile, p), lambda i, j: (i, j, 0)),
        ),
        compiler_params=pltpu.CompilerParams(
            dimension_semantics=("parallel", "parallel"),
            vmem_limit_bytes=vmem_limit),
    )(x_ph, w_mat)

    # Output is already channel-major: (N, Cout, P) -> (N, Cout, Hout, Wout).
    return out.reshape(n, c_out, h_out, w_out)


def _reference(x, weight, bias, stride):
    """Pure-JAX reference (conv + bias + instance norm + leaky relu)."""
    x_pad = jnp.pad(x, ((0, 0), (0, 0), (1, 1), (1, 1)), mode="reflect")
    y = lax.conv_general_dilated(
        x_pad, weight, window_strides=(stride, stride), padding="VALID",
        dimension_numbers=("NCHW", "OIHW", "NCHW"))
    y = y + bias.reshape(1, -1, 1, 1)
    mean = jnp.mean(y, axis=(2, 3), keepdims=True)
    var = jnp.mean((y - mean) ** 2, axis=(2, 3), keepdims=True)
    yn = (y - mean) * lax.rsqrt(var + EPS)
    return jnp.where(yn >= 0, yn, NEG_SLOPE * yn)


if __name__ == "__main__":
    # Small shapes consistent with the module: batch=2, Cin=4, Cout=8, 16x16, stride=2.
    key = jax.random.PRNGKey(0)
    kx, kw, kb = jax.random.split(key, 3)

    N, C_IN, C_OUT, H, W, STRIDE = 2, 4, 8, 16, 16, 2

    x = jax.random.normal(kx, (N, C_IN, H, W), dtype=jnp.float32)
    fan_in = C_IN * K * K
    weight = jax.random.normal(kw, (C_OUT, C_IN, K, K), dtype=jnp.float32) / jnp.sqrt(fan_in)
    bias = jax.random.normal(kb, (C_OUT,), dtype=jnp.float32) * 0.1

    out = block_forward(x, weight, bias, stride=STRIDE)
    out = jax.block_until_ready(out)

    ref = jax.block_until_ready(_reference(x, weight, bias, STRIDE))
    assert out.shape == (N, C_OUT, H // STRIDE, W // STRIDE), out.shape
    # bf16 matmul inputs (f32 accumulation + f32 InstanceNorm): modest tolerance,
    # documented — 1/sqrt(var) amplifies bf16 quantization when var is small.
    assert jnp.allclose(out, ref, rtol=2e-2, atol=2e-2), float(jnp.max(jnp.abs(out - ref)))

    print("KERNEL_OK")
</pallas_src>

<mosaic_0001>
module attributes {stable_mosaic.version = 11 : i64} {
  func.func @_block_kernel(%arg0: i32, %arg1: i32, %arg2: memref<4x4x9x9xbf16, #tpu.memory_space<vmem>>, %arg3: memref<8x64xbf16, #tpu.memory_space<vmem>>, %arg4: memref<1x8x64xf32, #tpu.memory_space<vmem>>) attributes {dimension_semantics = [#tpu.dimension_semantics<parallel>, #tpu.dimension_semantics<parallel>], iteration_bounds = array<i64: 2, 1>, scalar_prefetch = 0 : i64, scratch_operands = 0 : i64, tpu.core_type = #tpu.core_type<tc>, window_params = [{transform_indices = @transform_0, window_bounds = array<i64: 4, 4, 9, 9>}, {transform_indices = @transform_1, window_bounds = array<i64: 8, 64>}, {transform_indices = @transform_2, window_bounds = array<i64: 1, 8, 64>}]} {
    %c0 = arith.constant 0 : index
    %c0_0 = arith.constant 0 : index
    %c0_1 = arith.constant 0 : index
    %c0_2 = arith.constant 0 : index
    %0 = vector.load %arg2[%c0, %c0_0, %c0_1, %c0_2] : memref<4x4x9x9xbf16, #tpu.memory_space<vmem>>, vector<1x4x8x8xbf16>
    %1 = vector.shape_cast %0 : vector<1x4x8x8xbf16> to vector<4x8x8xbf16>
    %c1 = arith.constant 1 : index
    %c0_3 = arith.constant 0 : index
    %c0_4 = arith.constant 0 : index
    %c0_5 = arith.constant 0 : index
    %2 = vector.load %arg2[%c1, %c0_3, %c0_4, %c0_5] : memref<4x4x9x9xbf16, #tpu.memory_space<vmem>>, vector<1x4x8x8xbf16>
    %3 = vector.shape_cast %2 : vector<1x4x8x8xbf16> to vector<4x8x8xbf16>
    %c0_6 = arith.constant 0 : index
    %c0_7 = arith.constant 0 : index
    %c0_8 = arith.constant 0 : index
    %c1_9 = arith.constant 1 : index
    %4 = vector.load %arg2[%c0_6, %c0_7, %c0_8, %c1_9] : memref<4x4x9x9xbf16, #tpu.memory_space<vmem>>, vector<1x4x8x8xbf16>
    %5 = vector.shape_cast %4 : vector<1x4x8x8xbf16> to vector<4x8x8xbf16>
    %c1_10 = arith.constant 1 : index
    %c0_11 = arith.constant 0 : index
    %c0_12 = arith.constant 0 : index
    %c1_13 = arith.constant 1 : index
    %6 = vector.load %arg2[%c1_10, %c0_11, %c0_12, %c1_13] : memref<4x4x9x9xbf16, #tpu.memory_space<vmem>>, vector<1x4x8x8xbf16>
    %7 = vector.shape_cast %6 : vector<1x4x8x8xbf16> to vector<4x8x8xbf16>
    %c2 = arith.constant 2 : index
    %c0_14 = arith.constant 0 : index
    %c0_15 = arith.constant 0 : index
    %c0_16 = arith.constant 0 : index
    %8 = vector.load %arg2[%c2, %c0_14, %c0_15, %c0_16] : memref<4x4x9x9xbf16, #tpu.memory_space<vmem>>, vector<1x4x8x8xbf16>
    %9 = vector.shape_cast %8 : vector<1x4x8x8xbf16> to vector<4x8x8xbf16>
    %c3 = arith.constant 3 : index
    %c0_17 = arith.constant 0 : index
    %c0_18 = arith.constant 0 : index
    %c0_19 = arith.constant 0 : index
    %10 = vector.load %arg2[%c3, %c0_17, %c0_18, %c0_19] : memref<4x4x9x9xbf16, #tpu.memory_space<vmem>>, vector<1x4x8x8xbf16>
    %11 = vector.shape_cast %10 : vector<1x4x8x8xbf16> to vector<4x8x8xbf16>
    %c2_20 = arith.constant 2 : index
    %c0_21 = arith.constant 0 : index
    %c0_22 = arith.constant 0 : index
    %c1_23 = arith.constant 1 : index
    %12 = vector.load %arg2[%c2_20, %c0_21, %c0_22, %c1_23] : memref<4x4x9x9xbf16, #tpu.memory_space<vmem>>, vector<1x4x8x8xbf16>
    %13 = vector.shape_cast %12 : vector<1x4x8x8xbf16> to vector<4x8x8xbf16>
    %c3_24 = arith.constant 3 : index
    %c0_25 = arith.constant 0 : index
    %c0_26 = arith.constant 0 : index
    %c1_27 = arith.constant 1 : index
    %14 = vector.load %arg2[%c3_24, %c0_25, %c0_26, %c1_27] : memref<4x4x9x9xbf16, #tpu.memory_space<vmem>>, vector<1x4x8x8xbf16>
    %15 = vector.shape_cast %14 : vector<1x4x8x8xbf16> to vector<4x8x8xbf16>
    %c0_28 = arith.constant 0 : index
    %c0_29 = arith.constant 0 : index
    %c1_30 = arith.constant 1 : index
    %c0_31 = arith.constant 0 : index
    %16 = vector.load %arg2[%c0_28, %c0_29, %c1_30, %c0_31] : memref<4x4x9x9xbf16, #tpu.memory_space<vmem>>, vector<1x4x8x8xbf16>
    %17 = vector.shape_cast %16 : vector<1x4x8x8xbf16> to vector<4x8x8xbf16>
    %c1_32 = arith.constant 1 : index
    %c0_33 = arith.constant 0 : index
    %c1_34 = arith.constant 1 : index
    %c0_35 = arith.constant 0 : index
    %18 = vector.load %arg2[%c1_32, %c0_33, %c1_34, %c0_35] : memref<4x4x9x9xbf16, #tpu.memory_space<vmem>>, vector<1x4x8x8xbf16>
    %19 = vector.shape_cast %18 : vector<1x4x8x8xbf16> to vector<4x8x8xbf16>
    %c0_36 = arith.constant 0 : index
    %c0_37 = arith.constant 0 : index
    %c1_38 = arith.constant 1 : index
    %c1_39 = arith.constant 1 : index
    %20 = vector.load %arg2[%c0_36, %c0_37, %c1_38, %c1_39] : memref<4x4x9x9xbf16, #tpu.memory_space<vmem>>, vector<1x4x8x8xbf16>
    %21 = vector.shape_cast %20 : vector<1x4x8x8xbf16> to vector<4x8x8xbf16>
    %c1_40 = arith.constant 1 : index
    %c0_41 = arith.constant 0 : index
    %c1_42 = arith.constant 1 : index
    %c1_43 = arith.constant 1 : index
    %22 = vector.load %arg2[%c1_40, %c0_41, %c1_42, %c1_43] : memref<4x4x9x9xbf16, #tpu.memory_space<vmem>>, vector<1x4x8x8xbf16>
    %23 = vector.shape_cast %22 : vector<1x4x8x8xbf16> to vector<4x8x8xbf16>
    %c2_44 = arith.constant 2 : index
    %c0_45 = arith.constant 0 : index
    %c1_46 = arith.constant 1 : index
    %c0_47 = arith.constant 0 : index
    %24 = vector.load %arg2[%c2_44, %c0_45, %c1_46, %c0_47] : memref<4x4x9x9xbf16, #tpu.memory_space<vmem>>, vector<1x4x8x8xbf16>
    %25 = vector.shape_cast %24 : vector<1x4x8x8xbf16> to vector<4x8x8xbf16>
    %c3_48 = arith.constant 3 : index
    %c0_49 = arith.constant 0 : index
    %c1_50 = arith.constant 1 : index
    %c0_51 = arith.constant 0 : index
    %26 = vector.load %arg2[%c3_48, %c0_49, %c1_50, %c0_51] : memref<4x4x9x9xbf16, #tpu.memory_space<vmem>>, vector<1x4x8x8xbf16>
    %27 = vector.shape_cast %26 : vector<1x4x8x8xbf16> to vector<4x8x8xbf16>
    %c2_52 = arith.constant 2 : index
    %c0_53 = arith.constant 0 : index
    %c1_54 = arith.constant 1 : index
    %c1_55 = arith.constant 1 : index
    %28 = vector.load %arg2[%c2_52, %c0_53, %c1_54, %c1_55] : memref<4x4x9x9xbf16, #tpu.memory_space<vmem>>, vector<1x4x8x8xbf16>
    %29 = vector.shape_cast %28 : vector<1x4x8x8xbf16> to vector<4x8x8xbf16>
    %c3_56 = arith.constant 3 : index
    %c0_57 = arith.constant 0 : index
    %c1_58 = arith.constant 1 : index
    %c1_59 = arith.constant 1 : index
    %30 = vector.load %arg2[%c3_56, %c0_57, %c1_58, %c1_59] : memref<4x4x9x9xbf16, #tpu.memory_space<vmem>>, vector<1x4x8x8xbf16>
    %31 = vector.shape_cast %30 : vector<1x4x8x8xbf16> to vector<4x8x8xbf16>
    %32 = tpu.concatenate %1, %3, %5, %7, %9, %11, %13, %15, %17, %19, %21, %23, %25, %27, %29, %31 in 0 : vector<4x8x8xbf16>, vector<4x8x8xbf16>, vector<4x8x8xbf16>, vector<4x8x8xbf16>, vector<4x8x8xbf16>, vector<4x8x8xbf16>, vector<4x8x8xbf16>, vector<4x8x8xbf16>, vector<4x8x8xbf16>, vector<4x8x8xbf16>, vector<4x8x8xbf16>, vector<4x8x8xbf16>, vector<4x8x8xbf16>, vector<4x8x8xbf16>, vector<4x8x8xbf16>, vector<4x8x8xbf16> -> vector<64x8x8xbf16>
    %33 = vector.shape_cast %32 : vector<64x8x8xbf16> to vector<64x64xbf16>
    %c0_60 = arith.constant 0 : index
    %c0_61 = arith.constant 0 : index
    %34 = vector.load %arg3[%c0_60, %c0_61] : memref<8x64xbf16, #tpu.memory_space<vmem>>, vector<8x64xbf16>
    %cst = arith.constant dense<0.000000e+00> : vector<8x64xf32>
    %35 = tpu.matmul %34, %33, %cst {dimension_numbers = #tpu.dot_dimension_numbers<[1], [0], [0], [1], [0, 0, 1, 1], [], []>} : vector<8x64xbf16>, vector<64x64xbf16>, vector<8x64xf32> -> vector<8x64xf32>
    %cst_62 = arith.constant dense<0.000000e+00> : vector<8xf32>
    %36 = vector.multi_reduction <add>, %35, %cst_62 [1] : vector<8x64xf32> to vector<8xf32>
    %37 = vector.shape_cast %36 : vector<8xf32> to vector<8x1xf32>
    %cst_63 = arith.constant 6.400000e+01 : f32
    %38 = vector.broadcast %cst_63 : f32 to vector<8x1xf32>
    %39 = arith.divf %37, %38 : vector<8x1xf32>
    %40 = vector.broadcast %39 : vector<8x1xf32> to vector<8x64xf32>
    %41 = arith.subf %35, %40 : vector<8x64xf32>
    %42 = arith.mulf %41, %41 : vector<8x64xf32>
    %cst_64 = arith.constant dense<0.000000e+00> : vector<8xf32>
    %43 = vector.multi_reduction <add>, %42, %cst_64 [1] : vector<8x64xf32> to vector<8xf32>
    %44 = vector.shape_cast %43 : vector<8xf32> to vector<8x1xf32>
    %cst_65 = arith.constant 6.400000e+01 : f32
    %45 = vector.broadcast %cst_65 : f32 to vector<8x1xf32>
    %46 = arith.divf %44, %45 : vector<8x1xf32>
    %cst_66 = arith.constant 9.99999974E-6 : f32
    %47 = vector.broadcast %cst_66 : f32 to vector<8x1xf32>
    %48 = arith.addf %46, %47 : vector<8x1xf32>
    %49 = math.rsqrt %48 : vector<8x1xf32>
    %50 = vector.broadcast %49 : vector<8x1xf32> to vector<8x64xf32>
    %51 = arith.mulf %41, %50 : vector<8x64xf32>
    %cst_67 = arith.constant 0.000000e+00 : f32
    %52 = vector.broadcast %cst_67 : f32 to vector<8x64xf32>
    %53 = arith.cmpf oge, %51, %52 : vector<8x64xf32>
    %cst_68 = arith.constant 2.000000e-01 : f32
    %54 = vector.broadcast %cst_68 : f32 to vector<8x64xf32>
    %55 = arith.mulf %54, %51 : vector<8x64xf32>
    %56 = arith.select %53, %51, %55 : vector<8x64xi1>, vector<8x64xf32>
    %c0_69 = arith.constant 0 : index
    %c0_70 = arith.constant 0 : index
    %c0_71 = arith.constant 0 : index
    %57 = vector.load %arg4[%c0_69, %c0_70, %c0_71] : memref<1x8x64xf32, #tpu.memory_space<vmem>>, vector<1x8x64xf32>
    %58 = vector.shape_cast %57 : vector<1x8x64xf32> to vector<8x64xf32>
    %59 = vector.shape_cast %56 : vector<8x64xf32> to vector<1x8x64xf32>
    tpu.vector_store %arg4[%c0_69, %c0_70, %c0_71], %59 {strides = array<i32>} : memref<1x8x64xf32, #tpu.memory_space<vmem>>, vector<1x8x64xf32>,
    return
  }
  func.func @transform_0(%arg0: i32, %arg1: i32) -> (i32, i32, i32, i32) {
    %c0_i32 = arith.constant 0 : i32
    %c0_i32_0 = arith.constant 0 : i32
    %c0_i32_1 = arith.constant 0 : i32
    %c0_i32_2 = arith.constant 0 : i32
    return %arg0, %c0_i32, %c0_i32_0, %c0_i32_1 : i32, i32, i32, i32
  }
  func.func @transform_1(%arg0: i32, %arg1: i32) -> (i32, i32) {
    %c0_i32 = arith.constant 0 : i32
    %c0_i32_0 = arith.constant 0 : i32
    return %arg1, %c0_i32 : i32, i32
  }
  func.func @transform_2(%arg0: i32, %arg1: i32) -> (i32, i32, i32) {
    %c0_i32 = arith.constant 0 : i32
    %c0_i32_0 = arith.constant 0 : i32
    return %arg0, %arg1, %c0_i32 : i32, i32, i32
  }
}

</mosaic_0001>

<bundles_post_ra>
// kernel: block_forward.1
= control target key start
LH: loop header
LB: loop body
LE: loop exit
PB: predicated region body
PF: predicated region fallthrough
CT: control target
= control target key end

     0   :  { %s1862_s9 = smov 0   ;;  %s1864_s10 = smov 0   ;;  %s2627_s0 = inlined_call_operand.vmem [shape: bf16[8,4,9,9], index: 0, kind: input, shape index: {}]   ;;  %s2628_s1 = inlined_call_operand.vmem [shape: bf16[8,64], index: 1, kind: input, shape index: {}]   ;;  %s2629_s2 = inlined_call_operand.vmem [shape: f32[2,8,64], index: 2, kind: output, shape index: {}]  }
   0x1   :  { %s1866_s11 = smov 0  }
   0x2 LB: > { %s24_s12 = sadd.s32 1, %s1828_s10  ;;  %p1689_p0 = scmp.ge.s32.totalorder %s1832_s11, 1  ;;  %s1832_s11 = sphi %s1866_s11, %s12_s11   ;;  %s1828_s10 = sphi %s1864_s10, %s2685_s10   ;;  %s1824_s9 = sphi %s1862_s9, %s2684_s9  }
   0x3   : > { %p26_p1 = scmp.ge.s32.totalorder %s24_s12, 2  ;;  %p137_p2 = scmp.lt.s32.totalorder %s1832_s11, 3 }
   0x5   : > { %s2687_s12 = smov (%p26_p1, %s24_s12), 0  ;;  %p138_p3 = pnand %p1689_p0, %p137_p2 }
   0x7   : > { %141 = sbr.rel (%p138_p3) target bundleno = 873 (0x369), region = 28 }
   0xe   : > { %s1690_s13 = sshll.u32 %s1824_s9, 2  ;;  %v579_v0 = vlaneseq  ;;  %v1834_v1 = vmov 1983009808   ;;  %v1835_v3 = vmov 1934713408   ;;  %s1836_s18 = smov 127  }
   0xf   : > { %p167_p4 = scmp.lt.s32.totalorder %s1690_s13, 7  ;;  %v577_v2 = vunpack.c.l.s4 %v1834_v1  ;;  %v594_v4 = vunpack.c.l.s4 %v1835_v3  ;;  %vm284_vm0 = vsmask.f32 3328  ;;  %vm285_vm1 = vsmask.f32 7440  ;;  %s1838_s19 = smov 32  }
  0x10   : > { %v580_v6 = vshrl.u32 %v579_v0, 7  ;;  %vm2040_vm2 = vmor %vm284_vm0, %vm285_vm1  ;;  %s1839_s20 = smov 16   ;;  %s1840_s21 = smov 40   ;;  %vm1846_vm3 = vmmov 0   ;;  %vm1463_vm4 = vcmask 64512   ;;  %vm1476_vm5 = vcmask 130048  }
  0x11   : > { %s2689_s13 = smov (!%p167_p4, %s1690_s13), 7  ;;  %v578_v5 = vunpack.c.0.s8 %v577_v2  ;;  %v595_v7 = vunpack.c.0.s8 %v594_v4  ;;  %s1841_s22 = smov 48   ;;  %vm1485_vm6 = vcmask 195584   ;;  %vm1494_vm7 = vcmask 261120  }
  0x12   : > { %s1753_s14 = sshll.u32 %s2689_s13, 5  ;;  %s1842_s23 = smov 56   ;;  %vm1503_vm8 = vcmask 326656   ;;  %vm1512_vm9 = vcmask 392192   ;;  %vm1521_vm10 = vcmask 457728   ;;  %vm1535_vm11 = vcmask 523264  }
  0x13   : > { %s1886_s17 = scalar_lea.vmem %s2627_s0, %s1753_s14  ;;  %v1893_v11 = vsub.s32 %v578_v5, %v580_v6  ;;  %v1895_v12 = vsub.s32 %v595_v7, %v580_v6  ;;  %s1843_s24 = smov 8  }
  0x14   : > { %v1889_v8 = vld [vmem:[%s1886_s17 + $0x10] sm:$0xf]  ;;  %v185_v9 = vld [vmem:[%s1886_s17] sm:$0xf]  ;;  %v188_v10 = vld [vmem:[%s1886_s17 + $0x18] sm:$0xf] }
  0x15   : > { %228 = vrot.lane.b32.xlu1 %v1889_v8, %s1836_s18  ;;  %v316_v13 = vshrl.u32 %v1889_v8, 16  ;;  %v319_v14 = vshll.u32 %v1889_v8, 16  ;;  %224 = vrot.lane.b32.xlu0 %v185_v9, %s1836_s18  ;;  %v288_v15 = vshrl.u32 %v185_v9, 16  ;;  %v291_v16 = vshll.u32 %v185_v9, 16  ;;  %v186_v17 = vld [vmem:[%s1886_s17 + $0x8] sm:$0xf] }
  0x16   : > { %v330_v18 = vshrl.u32 %v188_v10, 16  ;;  %v333_v19 = vshll.u32 %v188_v10, 16  ;;  %v302_v20 = vshrl.u32 %v186_v17, 16  ;;  %v305_v21 = vshll.u32 %v186_v17, 16  ;;  %v1695_v26 = vld [vmem:[%s1886_s17 + $0x28] sm:$0xf] }
  0x17   : > { %v1903_v22 = vrot.slane %v316_v13, 4  ;;  %v1905_v23 = vrot.slane %v319_v14, 5  ;;  %v1907_v24 = vrot.slane %v288_v15, 4  ;;  %v1909_v25 = vrot.slane %v291_v16, 5  ;;  %v1694_v31 = vld [vmem:[%s1886_s17 + $0x20] sm:$0xf] }
  0x18   : > { %v1912_v27 = vrot.slane %v330_v18, 4  ;;  %v1914_v28 = vrot.slane %v333_v19, 5  ;;  %v1916_v29 = vrot.slane %v302_v20, 4  ;;  %v1918_v30 = vrot.slane %v305_v21, 5  ;;  %v1697_v36 = vld [vmem:[%s1886_s17 + $0x38] sm:$0xf] }
  0x19   : > { %230 = vrot.lane.b32.xlu1 %v188_v10, %s1836_s18  ;;  %226 = vrot.lane.b32.xlu0 %v186_v17, %s1836_s18  ;;  %v362_v32 = vshrl.u32 %v1695_v26, 16  ;;  %v365_v33 = vshll.u32 %v1695_v26, 16  ;;  %v609_v34 = vcombine.low %v186_v17, %v1695_v26  ;;  %v348_v35 = vshrl.u32 %v1694_v31, 16  ;;  %v1696_v49 = vld [vmem:[%s1886_s17 + $0x30] sm:$0xf]  ;;  %s1845_s25 = smov 24  }
  0x1a   : > { %v351_v37 = vshll.u32 %v1694_v31, 16  ;;  %v575_v38 = vcombine.low %v185_v9, %v1694_v31  ;;  %v390_v39 = vshrl.u32 %v1697_v36, 16  ;;  %v393_v40 = vshll.u32 %v1697_v36, 16  ;;  %v1699_v54 = vld [vmem:[%s1886_s17 + $0x48] sm:$0xf]  ;;  %p177_p5 = scmp.lt.s32.totalorder %s1824_s9, 1 }
  0x1b   : > { %v1924_v41 = vrot.slane %v362_v32, 4  ;;  %v1926_v42 = vrot.slane %v365_v33, 5  ;;  %v1929_v43 = vrot.slane %v609_v34, %v1893_v11  ;;  %v1931_v44 = vrot.slane %v348_v35, 4  ;;  %v1698_v55 = vld [vmem:[%s1886_s17 + $0x40] sm:$0xf] }
  0x1c   : > { %v1933_v45 = vrot.slane %v351_v37, 5  ;;  %v1936_v46 = vrot.slane %v575_v38, %v1893_v11  ;;  %v1938_v47 = vrot.slane %v390_v39, 4  ;;  %v1940_v48 = vrot.slane %v393_v40, 5  ;;  %v1701_v4 = vld [vmem:[%s1886_s17 + $0x58] sm:$0xf]  ;;  %s2691_s9 = smov (!%p177_p5, %s1824_s9), 1 }
  0x1d   : > { %242 = vrot.lane.b32.xlu1 %v1695_v26, %s1836_s18  ;;  %240 = vrot.lane.b32.xlu0 %v1694_v31, %s1836_s18  ;;  %v617_v50 = vcombine.low %v188_v10, %v1697_v36  ;;  %v376_v51 = vshrl.u32 %v1696_v49, 16  ;;  %v379_v52 = vshll.u32 %v1696_v49, 16  ;;  %v583_v53 = vcombine.low %v1889_v8, %v1696_v49  ;;  %v1700_v9 = vld [vmem:[%s1886_s17 + $0x50] sm:$0xf]  ;;  %v1703_v16 = vld [vmem:[%s1886_s17 + $0x68] sm:$0xf] }
  0x1e   : > { %v446_v56 = vshrl.u32 %v1699_v54, 16  ;;  %v449_v57 = vshll.u32 %v1699_v54, 16  ;;  %v432_v58 = vshrl.u32 %v1698_v55, 16  ;;  %v435_v59 = vshll.u32 %v1698_v55, 16  ;;  %v1702_v21 = vld [vmem:[%s1886_s17 + $0x60] sm:$0xf] }
  0x1f   : > { %v1949_v60 = vrot.slane %v617_v50, %v1893_v11  ;;  %v1951_v61 = vrot.slane %v376_v51, 4  ;;  %v1953_v62 = vrot.slane %v379_v52, 5  ;;  %v1956_v63 = vrot.slane %v583_v53, %v1893_v11  ;;  %v1989_v34 = vld [vmem:[%s1886_s17 + $0x78] sm:$0xf]  ;;  %v1704_v39 = vld [vmem:[%s1886_s17 + $0x70] sm:$0xf] }
  0x20   : > { %v1958_v0 = vrot.slane %v446_v56, 4  ;;  %v1960_v1 = vrot.slane %v449_v57, 5  ;;  %v1962_v2 = vrot.slane %v432_v58, 4  ;;  %v1964_v3 = vrot.slane %v435_v59, 5  ;;  %v205_v52 = vld [vmem:[%s1886_s17 + $0xc] sm:$0x1] }
  0x21   : > { %246 = vrot.lane.b32.xlu1 %v1697_v36, %s1836_s18  ;;  %v625_v5 = vcombine.low %v1929_v43, %v1949_v60  ;;  %v626_v6 = vcombine.high %v1929_v43, %v1949_v60  ;;  %244 = vrot.lane.b32.xlu0 %v1696_v49, %s1836_s18  ;;  %v591_v7 = vcombine.low %v1936_v46, %v1956_v63  ;;  %v474_v8 = vshrl.u32 %v1701_v4, 16  ;;  %v204_v58 = vld [vmem:[%s1886_s17 + $0x4] sm:$0x1]  ;;  %s1693_s28 = sshll.u32 %s2691_s9, 3 }
  0x22   : > { %v592_v10 = vcombine.high %v1936_v46, %v1956_v63  ;;  %v477_v13 = vshll.u32 %v1701_v4, 16  ;;  %v460_v14 = vshrl.u32 %v1700_v9, 16  ;;  %v463_v15 = vshll.u32 %v1700_v9, 16  ;;  %s183_s3 = scalar_lea.vmem %s2629_s2, %s1693_s28 }
  0x23   : > { %v1979_v17 = vrot.slane %v474_v8, 4  ;;  %v506_v18 = vshrl.u32 %v1703_v16, 16  ;;  %v509_v19 = vshll.u32 %v1703_v16, 16  ;;  %v745_v20 = vcombine.low %v1699_v54, %v1703_v16 }
  0x24   : > { %v1982_v26 = vrot.slane %v477_v13, 5  ;;  %v1984_v31 = vrot.slane %v460_v14, 4  ;;  %v1986_v32 = vrot.slane %v463_v15, 5  ;;  %v492_v33 = vshrl.u32 %v1702_v21, 16 }
  0x25   : > { %258 = vrot.lane.b32.xlu1 %v1699_v54, %s1836_s18  ;;  %256 = vrot.lane.b32.xlu0 %v1698_v55, %s1836_s18  ;;  %v1993_v35 = vrot.slane %v506_v18, 4  ;;  %v1995_v36 = vrot.slane %v509_v19, 5  ;;  %v1998_v37 = vrot.slane %v745_v20, %v1893_v11  ;;  %v495_v38 = vshll.u32 %v1702_v21, 16 }
  0x26   : > { %v2001_v40 = vrot.slane %v492_v33, 4  ;;  %v711_v49 = vcombine.low %v1698_v55, %v1702_v21  ;;  %v534_v50 = vshrl.u32 %v1989_v34, 16  ;;  %v537_v51 = vshll.u32 %v1989_v34, 16 }
  0x27   : > { %v2006_v53 = vrot.slane %v495_v38, 5  ;;  %v753_v54 = vcombine.low %v1701_v4, %v1989_v34  ;;  %v520_v56 = vshrl.u32 %v1704_v39, 16  ;;  %v523_v57 = vshll.u32 %v1704_v39, 16 }
  0x28   : > { %v2011_v59 = vrot.slane %v711_v49, %v1893_v11  ;;  %v2013_v8 = vrot.slane %v534_v50, 4  ;;  %v2015_v13 = vrot.slane %v537_v51, 5  ;;  %v719_v55 = vcombine.low %v1700_v9, %v1704_v39  ;;  %v1709_v50 = vld [vmem:[%s1886_s17 + $0x3c] sm:$0x1] }
  0x29   : > { %262 = vrot.lane.b32.xlu1 %v1701_v4, %s1836_s18  ;;  %260 = vrot.lane.b32.xlu0 %v1700_v9, %s1836_s18  ;;  %v2020_v14 = vrot.slane %v753_v54, %v1893_v11  ;;  %v2022_v15 = vrot.slane %v520_v56, 4  ;;  %v2024_v18 = vrot.slane %v523_v57, 5  ;;  %v308_v19 = vor.u32 %v1918_v30, %v1916_v29  ;;  %v207_v9 = vld [vmem:[%s1886_s17 + $0x1c] sm:$0x1] }
  0x2a   : > { %v2029_v20 = vrot.slane %v719_v55, %v1893_v11  ;;  %v311_v33 = vshll.u32 %v205_v52, 16  ;;  %v294_v4 = vor.u32 %v1909_v25, %v1907_v24  ;;  %v297_v38 = vshll.u32 %v204_v58, 16  ;;  %v206_v24 = vld [vmem:[%s1886_s17 + $0x14] sm:$0x1]  ;;  %v1707_v25 = vld [vmem:[%s1886_s17 + $0x2c] sm:$0x1] }
  0x2b   : > { %v309_v30 = vrot.slane %v308_v19, 4  ;;  %v336_v51 = vor.u32 %v1914_v28, %v1912_v27  ;;  %v339_v19 = vshll.u32 %v207_v9, 16  ;;  %v322_v27 = vor.u32 %v1905_v23, %v1903_v22  ;;  %v1706_v28 = vld [vmem:[%s1886_s17 + $0x24] sm:$0x1] }
  0x2c   : > { %v313_v56 = vrot.slane %v311_v33, 5  ;;  %v295_v57 = vrot.slane %v294_v4, 4  ;;  %v299_v58 = vrot.slane %v297_v38, 5  ;;  %v325_v52 = vshll.u32 %v206_v24, 16 }
  0x2d   : > { %274 = vrot.lane.b32.xlu1 %v1703_v16, %s1836_s18  ;;  %272 = vrot.lane.b32.xlu0 %v1702_v21, %s1836_s18  ;;  %v337_v55 = vrot.slane %v336_v51, 4  ;;  %v368_v33 = vor.u32 %v1926_v42, %v1924_v41  ;;  %v371_v4 = vshll.u32 %v1707_v25, 16  ;;  %v341_v21 = vrot.slane %v339_v19, 5 }
  0x2e   : > { %v314_v49 = vsel %vm2040_vm2, %v309_v30, %v313_v56  ;;  %v300_v16 = vsel %vm2040_vm2, %v295_v57, %v299_v58  ;;  %v323_v38 = vrot.slane %v322_v27, 4  ;;  %v354_v9 = vor.u32 %v1933_v45, %v1931_v44  ;;  %v1708_v30 = vld [vmem:[%s1886_s17 + $0x34] sm:$0x1]  ;;  %v1711_v44 = vld [vmem:[%s1886_s17 + $0x4c] sm:$0x1] }
  0x2f   : > { %v327_v22 = vrot.slane %v325_v52, 5  ;;  %v369_v23 = vrot.slane %v368_v33, 4  ;;  %v373_v51 = vrot.slane %v371_v4, 5  ;;  %v357_v54 = vshll.u32 %v1706_v28, 16  ;;  %v1710_v27 = vld [vmem:[%s1886_s17 + $0x44] sm:$0x1] }
  0x30   : > { %v342_v41 = vsel %vm2040_vm2, %v337_v55, %v341_v21  ;;  %v355_v42 = vrot.slane %v354_v9, 4  ;;  %v396_v24 = vor.u32 %v1940_v48, %v1938_v47  ;;  %v399_v25 = vshll.u32 %v1709_v50, 16 }
  0x31   : > { %278 = vrot.lane.b32.xlu1 %v1989_v34, %s1836_s18  ;;  %276 = vrot.lane.b32.xlu0 %v1704_v39, %s1836_s18  ;;  %v328_v45 = vsel %vm2040_vm2, %v323_v38, %v327_v22  ;;  %v374_v52 = vsel %vm2040_vm2, %v369_v23, %v373_v51  ;;  %v359_v56 = vrot.slane %v357_v54, 5  ;;  %v382_v34 = vor.u32 %v1953_v62, %v1951_v61  ;;  %v1712_v22 = vld [vmem:[%s1886_s17 + $0x54] sm:$0x1] }
  0x32   : > { %v881_v39 = vcombine.low %v314_v49, %v374_v52  ;;  %v397_v57 = vrot.slane %v396_v24, 4  ;;  %v401_v58 = vrot.slane %v399_v25, 5  ;;  %v385_v55 = vshll.u32 %v1708_v30, 16 }
  0x33   : > { %v360_v47 = vsel %vm2040_vm2, %v355_v42, %v359_v56  ;;  %v383_v48 = vrot.slane %v382_v34, 4  ;;  %v452_v50 = vor.u32 %v1960_v1, %v1958_v0  ;;  %v455_v19 = vshll.u32 %v1711_v44, 16  ;;  %v1713_v1 = vld [vmem:[%s1886_s17 + $0x5c] sm:$0x1]  ;;  %v1715_v34 = vld [vmem:[%s1886_s17 + $0x6c] sm:$0x1] }
  0x34   : > { %v888_v61 = vrot.slane %v881_v39, %v1893_v11  ;;  %v847_v62 = vcombine.low %v300_v16, %v360_v47  ;;  %v402_v54 = vsel %vm2040_vm2, %v397_v57, %v401_v58  ;;  %v387_v28 = vrot.slane %v385_v55, 5  ;;  %v1714_v58 = vld [vmem:[%s1886_s17 + $0x64] sm:$0x1] }
  0x35   : > { %409 = vrot.lane.b32.xlu1 %v314_v49, %s1836_s18  ;;  %407 = vrot.lane.b32.xlu0 %v300_v16, %s1836_s18  ;;  %v889_v33 = vcombine.low %v342_v41, %v402_v54  ;;  %v453_v4 = vrot.slane %v452_v50, 4  ;;  %v457_v21 = vrot.slane %v455_v19, 5  ;;  %v438_v0 = vor.u32 %v1964_v3, %v1962_v2  ;;  %v1717_v50 = vld [vmem:[%s1886_s17 + $0x7c] sm:$0x1] }
  0x36   : > { %v854_v38 = vrot.slane %v847_v62, %v1893_v11  ;;  %v388_v49 = vsel %vm2040_vm2, %v383_v48, %v387_v28  ;;  %v441_v9 = vshll.u32 %v1710_v27, 16  ;;  %v480_v16 = vor.u32 %v1982_v26, %v1979_v17 }
  0x37   : > { %v896_v23 = vrot.slane %v889_v33, %v1893_v11  ;;  %v855_v51 = vcombine.low %v328_v45, %v388_v49  ;;  %v458_v30 = vsel %vm2040_vm2, %v453_v4, %v457_v21  ;;  %v439_v42 = vrot.slane %v438_v0, 4 }
  0x38   : > { %v443_v2 = vrot.slane %v441_v9, 5  ;;  %v481_v3 = vrot.slane %v480_v16, 4  ;;  %v483_v24 = vshll.u32 %v1713_v1, 16  ;;  %v466_v17 = vor.u32 %v1986_v32, %v1984_v31 }
  0x39   : > { %413 = vrot.lane.b32.xlu1 %v342_v41, %s1836_s18  ;;  %411 = vrot.lane.b32.xlu0 %v328_v45, %s1836_s18  ;;  %v897_v26 = vcombine.low %v888_v61, %v896_v23  ;;  %v898_v25 = vcombine.high %v888_v61, %v896_v23  ;;  %v862_v44 = vrot.slane %v855_v51, %v1893_v11  ;;  %v469_v56 = vshll.u32 %v1712_v22, 16 }
  0x3a   : > { %v444_v39 = vsel %vm2040_vm2, %v439_v42, %v443_v2  ;;  %v485_v41 = vrot.slane %v483_v24, 5  ;;  %v467_v57 = vrot.slane %v466_v17, 4  ;;  %v512_v45 = vor.u32 %v1995_v36, %v1993_v35  ;;  %v1716_v36 = vld [vmem:[%s1886_s17 + $0x74] sm:$0x1] }
  0x3b   : > { %v2115_v55 = vrot.slane %v897_v26, %v1895_v12  ;;  %v2118_v31 = vrot.slane %v898_v25, %v1895_v12  ;;  %v863_v32 = vcombine.low %v854_v38, %v862_v44  ;;  %v864_v48 = vcombine.high %v854_v38, %v862_v44 }
  0x3c   : > { %v486_v19 = vsel %vm2040_vm2, %v481_v3, %v485_v41  ;;  %v471_v27 = vrot.slane %v469_v56, 5  ;;  %v513_v61 = vrot.slane %v512_v45, 4  ;;  %v515_v35 = vshll.u32 %v1715_v34, 16 }
  0x3d   : > { %421 = vrot.lane.b32.xlu1 %v374_v52, %s1836_s18  ;;  %419 = vrot.lane.b32.xlu0 %v360_v47, %s1836_s18  ;;  %v2127_v62 = vrot.slane %v863_v32, %v1895_v12  ;;  %v2130_v28 = vrot.slane %v864_v48, %v1895_v12  ;;  %v498_v33 = vor.u32 %v2006_v53, %v2001_v40  ;;  %v501_v4 = vshll.u32 %v1714_v58, 16 }
  0x3e   : > { %v472_v52 = vsel %vm2040_vm2, %v467_v57, %v471_v27  ;;  %v517_v47 = vrot.slane %v515_v35, 5  ;;  %v540_v21 = vor.u32 %v2015_v13, %v2013_v8  ;;  %v543_v0 = vshll.u32 %v1717_v50, 16 }
  0x3f   : > { %v499_v1 = vrot.slane %v498_v33, 4  ;;  %v503_v38 = vrot.slane %v501_v4, 5  ;;  %v526_v9 = vor.u32 %v2024_v18, %v2022_v15  ;;  %v529_v16 = vshll.u32 %v1716_v36, 16 }
  0x40   : > { %v518_v40 = vsel %vm2040_vm2, %v513_v61, %v517_v47  ;;  %v541_v53 = vrot.slane %v540_v21, 4  ;;  %v545_v22 = vrot.slane %v543_v0, 5  ;;  %v2148_v8 = vrot.slane %v592_v10, %v1895_v12 }
  0x41   : > { %425 = vrot.lane.b32.xlu1 %v402_v54, %s1836_s18  ;;  %423 = vrot.lane.b32.xlu0 %v388_v49, %s1836_s18  ;;  %v1017_v13 = vcombine.low %v458_v30, %v518_v40  ;;  %v504_v15 = vsel %vm2040_vm2, %v499_v1, %v503_v38  ;;  %v527_v18 = vrot.slane %v526_v9, 4  ;;  %v531_v23 = vrot.slane %v529_v16, 5 }
  0x42   : > { %v983_v54 = vcombine.low %v444_v39, %v504_v15  ;;  %v546_v49 = vsel %vm2040_vm2, %v541_v53, %v545_v22  ;;  %v2158_v51 = vrot.slane %v626_v6, %v1895_v12  ;;  %v2164_v10 = vrot.slane %v591_v7, %v1895_v12 }
  0x43   : > { %v1024_v42 = vrot.slane %v1017_v13, %v1893_v11  ;;  %v1025_v2 = vcombine.low %v486_v19, %v546_v49  ;;  %v532_v3 = vsel %vm2040_vm2, %v527_v18, %v531_v23  ;;  %v1134_v46 = vshrl.u32 %v2148_v8, 16 }
  0x44   : > { %v990_v24 = vrot.slane %v983_v54, %v1893_v11  ;;  %v991_v6 = vcombine.low %v472_v52, %v532_v3  ;;  %v2630_v7 = vmov 0   ;;  %v2184_v29 = vrot.slane %v625_v5, %v1895_v12 }
  0x45   : > { %553 = vrot.lane.b32.xlu1 %v458_v30, %s1836_s18  ;;  %551 = vrot.lane.b32.xlu0 %v444_v39, %s1836_s18  ;;  %v1032_v63 = vrot.slane %v1025_v2, %v1893_v11  ;;  %v2178_v26 = vcombine.high %v2164_v10, %v2630_v7  ;;  %v1135_v30 = vshrl.u32 %v2158_v51, 16  ;;  %v2190_v44 = vcombine.high %v2148_v8, %v2630_v7 }
  0x46   : > { %v998_v25 = vrot.slane %v991_v6, %v1893_v11  ;;  %v2194_v56 = vcombine.high %v2158_v51, %v2630_v7  ;;  %v2640_v34 = vcombine.high %v2011_v59, %v2029_v20  ;;  %v2204_v5 = vcombine.high %v2184_v29, %v2630_v7 }
  0x47   : > { %v1033_v43 = vcombine.low %v1024_v42, %v1032_v63  ;;  %v1034_v60 = vcombine.high %v1024_v42, %v1032_v63  ;;  %v2206_v41 = vpack.i.b16 %v1135_v30, %v1134_v46  ;;  %v1140_v32 = vshrl.u32 %v2190_v44, 16 }
  0x48   : > { %v2200_v39 = vrot.slane %v2640_v34, %v1895_v12  ;;  %v999_v57 = vcombine.low %v990_v24, %v998_v25  ;;  %v1000_v45 = vcombine.high %v990_v24, %v998_v25  ;;  %v2643_v36 = vcombine.high %v1998_v37, %v2020_v14 }
  0x49   : > { %557 = vrot.lane.b32.xlu1 %v486_v19, %s1836_s18  ;;  %555 = vrot.lane.b32.xlu0 %v472_v52, %s1836_s18  ;;  %v2214_v48 = vrot.slane %v1033_v43, %v1895_v12  ;;  %v2217_v50 = vrot.slane %v1034_v60, %v1895_v12  ;;  %v1141_v19 = vshrl.u32 %v2194_v56, 16  ;;  %v1122_v4 = vshrl.u32 %v2164_v10, 16 }
  0x4a   : > { %v2223_v61 = vrot.slane %v999_v57, %v1895_v12  ;;  %v2226_v35 = vrot.slane %v1000_v45, %v1895_v12  ;;  %v2232_v33 = vrot.slane %v2643_v36, %v1895_v12  ;;  %v1123_v47 = vshrl.u32 %v2184_v29, 16 }
  0x4b   : > { %2641 = vst [vmem:[#allocation2_spill] sm:$0xff] %v2217_v50  ;;  %v2235_v52 = vpack.i.b16 %v1141_v19, %v1140_v32  ;;  %v2644_v21 = vcombine.low %v2011_v59, %v2029_v20  ;;  %v2645_v1 = vcombine.low %v1998_v37, %v2020_v14  ;;  %v1182_v16 = vshrl.u32 %v2200_v39, 16 }
  0x4c   : > { %2642 = vst [vmem:[#allocation3_spill] sm:$0xff] %v2226_v35  ;;  %v1183_v53 = vshrl.u32 %v2232_v33, 16  ;;  %v2258_v20 = vpack.i.b16 %v1123_v47, %v1122_v4  ;;  %v2278_v18 = vcombine.high %v2232_v33, %v2630_v7  ;;  %v1218_v54 = vshrl.u32 %v2127_v62, 16 }
  0x4d   : > { %v2242_v0 = vrot.slane %v2644_v21, %v1895_v12  ;;  %v2248_v38 = vrot.slane %v2645_v1, %v1895_v12  ;;  %565 = vrot.lane.b32.xlu1 %v518_v40, %s1836_s18  ;;  %563 = vrot.lane.b32.xlu0 %v504_v15, %s1836_s18  ;;  %v2274_v15 = vcombine.high %v2200_v39, %v2630_v7  ;;  %v1219_v42 = vshrl.u32 %v2115_v55, 16 }
  0x4e   : > { %v2270_v13 = vpack.i.b16 %v1183_v53, %v1182_v16  ;;  %v1128_v2 = vshrl.u32 %v2178_v26, 16  ;;  %v1129_v46 = vshrl.u32 %v2204_v5, 16  ;;  %v2294_v63 = vcombine.high %v2127_v62, %v2630_v7 }
  0x4f   : > { %v1170_v37 = vshrl.u32 %v2242_v0, 16  ;;  %v1171_v14 = vshrl.u32 %v2248_v38, 16  ;;  %v2264_v40 = vcombine.high %v2242_v0, %v2630_v7  ;;  %v2268_v22 = vcombine.high %v2248_v38, %v2630_v7 }
  0x50   : > { %v2296_v30 = vpack.i.b16 %v1219_v42, %v1218_v54  ;;  %v2300_v25 = vcombine.high %v2115_v55, %v2630_v7  ;;  %v2304_v34 = vpack.i.b16 %v1129_v46, %v1128_v2  ;;  %v1230_v43 = vshrl.u32 %v2130_v28, 16 }
  0x51   : > { %v2280_v23 = vpack.i.b16 %v1171_v14, %v1170_v37  ;;  %569 = vrot.lane.b32.xlu1 %v546_v49, %s1836_s18  ;;  %567 = vrot.lane.b32.xlu0 %v532_v3, %s1836_s18  ;;  %v1176_v49 = vshrl.u32 %v2264_v40, 16  ;;  %v1177_v3 = vshrl.u32 %v2268_v22, 16  ;;  %v1231_v60 = vshrl.u32 %v2118_v31, 16 }
  0x52   : > { %v1188_v57 = vshrl.u32 %v2274_v15, 16  ;;  %v1189_v19 = vshrl.u32 %v2278_v18, 16  ;;  %v2316_v36 = vcombine.high %v2130_v28, %v2630_v7  ;;  %v2322_v47 = vcombine.high %v2118_v31, %v2630_v7 }
  0x53   : > { %v2311_v32 = vpack.i.b16 %v1177_v3, %v1176_v49  ;;  %v2318_v4 = vpack.i.b16 %v1231_v60, %v1230_v43  ;;  %v1278_v1 = vshrl.u32 %v2226_v35, 16  ;;  %v1279_v53 = vshrl.u32 %v2217_v50, 16 }
  0x54   : > { %v2327_v16 = vpack.i.b16 %v1189_v19, %v1188_v57  ;;  %v1266_v37 = vshrl.u32 %v2223_v61, 16  ;;  %v1267_v14 = vshrl.u32 %v2214_v48, 16  ;;  %v1224_v42 = vshrl.u32 %v2294_v63, 16 }
  0x55   : > { %v1225_v2 = vshrl.u32 %v2300_v25, 16  ;;  %v2338_v46 = vcombine.high %v2223_v61, %v2630_v7  ;;  %v2340_v49 = vpack.i.b16 %v1279_v53, %v1278_v1  ;;  %v2346_v43 = vcombine.high %v2214_v48, %v2630_v7 }
  0x56   : > { %v2342_v3 = vpack.i.b16 %v1267_v14, %v1266_v37  ;;  %v1236_v60 = vshrl.u32 %v2316_v36, 16  ;;  %v1237_v19 = vshrl.u32 %v2322_v47, 16  ;;  %v2355_v54 = vcombine.high %v2226_v35, %v2630_v7 }
  0x57   : > { %2646 = vst [vmem:[#allocation4_spill] sm:$0xff] %v2338_v46  ;;  %2647 = vst [vmem:[#allocation5_spill] sm:$0xff] %v2340_v49  ;;  %v2349_v57 = vpack.i.b16 %v1225_v2, %v1224_v42  ;;  %v1272_v21 = vshrl.u32 %v2338_v46, 16  ;;  %v1273_v53 = vshrl.u32 %v2346_v43, 16  ;;  %v2362_v37 = vcombine.high %v2217_v50, %v2630_v7 }
  0x58   : > { %2648 = vst [vmem:[#allocation6_spill] sm:$0xff] %v2342_v3  ;;  %2649 = vst [vmem:[#allocation7_spill] sm:$0xff] %v2346_v43  ;;  %v1121_v14 = vpack.i.b16 %v2184_v29, %v2164_v10  ;;  %v2366_v42 = vpack.i.b16 %v1237_v19, %v1236_v60  ;;  %v1284_v2 = vshrl.u32 %v2355_v54, 16  ;;  %v2658_v49 = vpack.i.b16 %v2204_v5, %v2178_v26 }
  0x59   : > { %2650 = vst [vmem:[#allocation8_spill] sm:$0xff] %v2349_v57  ;;  %2651 = vst [vmem:[#allocation9_spill] sm:$0xff] %v2355_v54  ;;  %v2373_v1 = vpack.i.b16 %v1273_v53, %v1272_v21  ;;  %v1285_v59 = vshrl.u32 %v2362_v37, 16 }
  0x5a   : > { %2652 = vst [vmem:[#allocation10_spill] sm:$0xff] %v2362_v37  ;;  %2653 = vst [vmem:[#allocation11_spill] sm:$0xff] %v2366_v42 }
  0x5b   : > { %2654 = vst [vmem:[#allocation12_spill] sm:$0xff] %v2373_v1  ;;  %v2380_v29 = vpack.i.b16 %v1285_v59, %v1284_v2 }
  0x5d   : > { %2655 = vst [vmem:[#allocation13_spill] sm:$0xff] %v2380_v29 }
  0x87   : > { %v229_v60 = vpop.permute.xlu1 %228  ;;  %v225_v19 = vpop.permute.xlu0 %224 }
  0x8b   : > { %v231_v9 = vpop.permute.xlu1 %230  ;;  %v227_v58 = vpop.permute.xlu0 %226 }
  0x8f   : > { %v243_v45 = vpop.permute.xlu1 %242  ;;  %v241_v27 = vpop.permute.xlu0 %240 }
  0x90   : > { %v677_v17 = vcombine.low %v227_v58, %v243_v45  ;;  %v643_v6 = vcombine.low %v225_v19, %v241_v27 }
  0x92   : > { %v684_v42 = vrot.slane %v677_v17, %v1893_v11  ;;  %v650_v24 = vrot.slane %v643_v6, %v1893_v11 }
  0x93   : > { %v247_v21 = vpop.permute.xlu1 %246  ;;  %v245_v53 = vpop.permute.xlu0 %244 }
  0x94   : > { %v685_v7 = vcombine.low %v231_v9, %v247_v21  ;;  %v651_v1 = vcombine.low %v229_v60, %v245_v53 }
  0x96   : > { %v692_v10 = vrot.slane %v685_v7, %v1893_v11  ;;  %v658_v59 = vrot.slane %v651_v1, %v1893_v11  ;;  %v2656_v1 = vmov 0  }
  0x97   : > { %v259_v2 = vpop.permute.xlu1 %258  ;;  %v257_v54 = vpop.permute.xlu0 %256 }
  0x98   : > { %v693_v37 = vcombine.low %v684_v42, %v692_v10  ;;  %v694_v29 = vcombine.high %v684_v42, %v692_v10  ;;  %v659_v46 = vcombine.low %v650_v24, %v658_v59  ;;  %v660_v43 = vcombine.high %v650_v24, %v658_v59 }
  0x99   : > { %v2657_v10 = vpack.i.b16 %v2158_v51, %v2148_v8 }
  0x9a   : > { %v2387_v58 = vrot.slane %v693_v37, %v1895_v12  ;;  %v708_v27 = vrot.slane %v694_v29, %v1895_v12  ;;  %v2391_v9 = vrot.slane %v659_v46, %v1895_v12  ;;  %v674_v17 = vrot.slane %v660_v43, %v1895_v12 }
  0x9b   : > { %v263_v6 = vpop.permute.xlu1 %262  ;;  %v261_v7 = vpop.permute.xlu0 %260 }
  0x9c   : > { %v1157_v45 = vpack.i.b16 %v708_v27, %v674_v17  ;;  %v2396_v60 = vcombine.high %v2391_v9, %v2656_v1  ;;  %v2400_v24 = vcombine.high %v2387_v58, %v2656_v1  ;;  %v1158_v37 = vshrl.u32 %v674_v17, 16 }
  0x9d   : > { %v1159_v42 = vshrl.u32 %v708_v27, 16  ;;  %v676_v53 = vcombine.high %v674_v17, %v2656_v1  ;;  %v710_v59 = vcombine.high %v708_v27, %v2656_v1  ;;  %v1145_v51 = vpack.i.b16 %v2387_v58, %v2391_v9 }
  0x9e   : > { %v1734_v46 = vcombine.low %v2657_v10, %v1157_v45  ;;  %v1151_v43 = vpack.i.b16 %v2400_v24, %v2396_v60 }
  0x9f   : > { %v275_v29 = vpop.permute.xlu1 %274  ;;  %v273_v19 = vpop.permute.xlu0 %272  ;;  %v1160_v21 = vpack.i.b16 %v1159_v42, %v1158_v37  ;;  %v2416_v37 = vcombine.low %v1121_v14, %v1145_v51  ;;  %v1165_v17 = vshrl.u32 %v710_v59, 16 }
  0xa0   : > { %1395 = vrot.lane.b32.xlu1 %v1734_v46, %s1838_s19  ;;  %v813_v57 = vcombine.low %v259_v2, %v275_v29  ;;  %v779_v3 = vcombine.low %v257_v54, %v273_v19  ;;  %v1726_v8 = vcombine.low %v2658_v49, %v1151_v43  ;;  %v1163_v2 = vpack.i.b16 %v710_v59, %v676_v53 }
  0xa1   : > { %v1738_v27 = vcombine.low %v2206_v41, %v1160_v21  ;;  %v1164_v54 = vshrl.u32 %v676_v53, 16  ;;  %v2659_v41 = vpack.i.b16 %v2194_v56, %v2190_v44 }
  0xa2   : > { %v820_v26 = vrot.slane %v813_v57, %v1893_v11  ;;  %v786_v5 = vrot.slane %v779_v3, %v1893_v11  ;;  %v1146_v3 = vshrl.u32 %v2391_v9, 16 }
  0xa3   : > { %v279_v45 = vpop.permute.xlu1 %278  ;;  %v277_v10 = vpop.permute.xlu0 %276  ;;  %v1742_v19 = vcombine.low %v2659_v41, %v1163_v2  ;;  %v1166_v57 = vpack.i.b16 %v1165_v17, %v1164_v54 }
  0xa4   : > { %v821_v35 = vcombine.low %v263_v6, %v279_v45  ;;  %v787_v50 = vcombine.low %v261_v7, %v277_v10  ;;  %1355 = vrot.lane.b32.xlu1 %v1726_v8, %s1839_s20 }
  0xa5   : > { %v1746_v9 = vcombine.low %v2235_v52, %v1166_v57 }
  0xa6   : > { %v828_v49 = vrot.slane %v821_v35, %v1893_v11  ;;  %v794_v42 = vrot.slane %v787_v50, %v1893_v11  ;;  %v1147_v35 = vshrl.u32 %v2387_v58, 16  ;;  %v2660_v58 = vpack.i.b16 %v2232_v33, %v2200_v39 }
  0xa7   : > { %v410_v6 = vpop.permute.xlu1 %409  ;;  %v408_v7 = vpop.permute.xlu0 %407 }
  0xa8   : > { %v829_v46 = vcombine.low %v820_v26, %v828_v49  ;;  %v830_v43 = vcombine.high %v820_v26, %v828_v49  ;;  %v795_v29 = vcombine.low %v786_v5, %v794_v42  ;;  %v796_v14 = vcombine.high %v786_v5, %v794_v42  ;;  %1415 = vrot.lane.b32.xlu1 %v1738_v27, %s1840_s21 }
  0xa9   : > { %v1148_v27 = vpack.i.b16 %v1147_v35, %v1146_v3 }
  0xaa   : > { %v837_v50 = vrot.slane %v829_v46, %v1895_v12  ;;  %v844_v21 = vrot.slane %v830_v43, %v1895_v12  ;;  %v803_v53 = vrot.slane %v795_v29, %v1895_v12  ;;  %v810_v59 = vrot.slane %v796_v14, %v1895_v12 }
  0xab   : > { %v414_v8 = vpop.permute.xlu1 %413  ;;  %v412_v51 = vpop.permute.xlu0 %411  ;;  %v1722_v39 = vcombine.low %v2258_v20, %v1148_v27  ;;  %v2661_v14 = vpack.i.b16 %v2248_v38, %v2242_v0 }
  0xac   : > { %1435 = vrot.lane.b32.xlu1 %v1742_v19, %s1841_s22  ;;  %v1205_v44 = vpack.i.b16 %v844_v21, %v810_v59  ;;  %v1194_v56 = vshrl.u32 %v803_v53, 16  ;;  %v1195_v45 = vshrl.u32 %v837_v50, 16  ;;  %v2441_v26 = vcombine.high %v803_v53, %v2656_v1 }
  0xad   : > { %v2444_v5 = vcombine.high %v837_v50, %v2656_v1  ;;  %v1193_v33 = vpack.i.b16 %v837_v50, %v803_v53  ;;  %v1207_v20 = vshrl.u32 %v844_v21, 16 }
  0xae   : > { %v1735_v10 = vcombine.low %v2660_v58, %v1205_v44  ;;  %v1196_v17 = vpack.i.b16 %v1195_v45, %v1194_v56  ;;  %v2468_v58 = vcombine.high %v844_v21, %v2656_v1  ;;  %v1153_v21 = vshrl.u32 %v2400_v24, 16 }
  0xaf   : > { %v422_v2 = vpop.permute.xlu1 %421  ;;  %v420_v54 = vpop.permute.xlu0 %419  ;;  %v2451_v41 = vcombine.low %v2661_v14, %v1193_v33 }
  0xb0   : > { %1455 = vrot.lane.b32.xlu1 %v1746_v9, %s1842_s23  ;;  %1397 = vrot.lane.b32.xlu0 %v1735_v10, %s1838_s19  ;;  %v949_v52 = vcombine.low %v410_v6, %v422_v2  ;;  %v915_v49 = vcombine.low %v408_v7, %v420_v54  ;;  %v1723_v19 = vcombine.low %v2280_v23, %v1196_v17  ;;  %v1206_v7 = vshrl.u32 %v810_v59, 16 }
  0xb1   : > { %v1199_v6 = vpack.i.b16 %v2444_v5, %v2441_v26  ;;  %v2662_v23 = vpack.i.b16 %v2268_v22, %v2264_v40  ;;  %v2465_v9 = vcombine.high %v810_v59, %v2656_v1  ;;  %v1152_v40 = vshrl.u32 %v2396_v60, 16 }
  0xb2   : > { %v956_v57 = vrot.slane %v949_v52, %v1893_v11  ;;  %v922_v3 = vrot.slane %v915_v49, %v1893_v11  ;;  %v1208_v45 = vpack.i.b16 %v1207_v20, %v1206_v7 }
  0xb3   : > { %v426_v42 = vpop.permute.xlu1 %425  ;;  %v424_v46 = vpop.permute.xlu0 %423  ;;  %v1727_v56 = vcombine.low %v2662_v23, %v1199_v6  ;;  %v1154_v24 = vpack.i.b16 %v1153_v21, %v1152_v40 }
  0xb4   : > { %v957_v43 = vcombine.low %v414_v8, %v426_v42  ;;  %v923_v29 = vcombine.low %v412_v51, %v424_v46  ;;  %1335 = vrot.lane.b32.xlu0 %v1722_v39, %s1843_s24  ;;  %v1211_v39 = vpack.i.b16 %v2468_v58, %v2465_v9  ;;  %v1739_v33 = vcombine.low %v2270_v13, %v1208_v45 }
  0xb5   : > { %v2663_v42 = vpack.i.b16 %v2118_v31, %v2130_v28  ;;  %v2664_v13 = vpack.i.b16 %v2278_v18, %v2274_v15  ;;  %v1200_v31 = vshrl.u32 %v2441_v26, 16  ;;  %v1201_v28 = vshrl.u32 %v2444_v5, 16 }
  0xb6   : > { %v964_v35 = vrot.slane %v957_v43, %v1893_v11  ;;  %v930_v50 = vrot.slane %v923_v29, %v1893_v11  ;;  %v1730_v15 = vcombine.low %v2304_v34, %v1154_v24  ;;  %v1212_v26 = vshrl.u32 %v2465_v9, 16 }
  0xb7   : > { %v554_v53 = vpop.permute.xlu1 %553  ;;  %v552_v8 = vpop.permute.xlu0 %551  ;;  %v1743_v6 = vcombine.low %v2664_v13, %v1211_v39  ;;  %v1202_v18 = vpack.i.b16 %v1201_v28, %v1200_v31  ;;  %v2665_v5 = vpack.i.b16 %v2115_v55, %v2127_v62  ;;  %v2666_v9 = vpack.i.b16 %v2300_v25, %v2294_v63 }
  0xb8   : > { %v965_v0 = vcombine.low %v956_v57, %v964_v35  ;;  %v966_v38 = vcombine.high %v956_v57, %v964_v35  ;;  %v931_v51 = vcombine.low %v922_v3, %v930_v50  ;;  %v932_v44 = vcombine.high %v922_v3, %v930_v50  ;;  %1337 = vrot.lane.b32.xlu0 %v1723_v19, %s1843_s24 }
  0xba   : > { %v973_v10 = vrot.slane %v965_v0, %v1895_v12  ;;  %v980_v27 = vrot.slane %v966_v38, %v1895_v12  ;;  %v939_v2 = vrot.slane %v931_v51, %v1895_v12  ;;  %v946_v54 = vrot.slane %v932_v44, %v1895_v12 }
  0xbb   : > { %v558_v17 = vpop.permute.xlu1 %557  ;;  %v556_v52 = vpop.permute.xlu0 %555 }
  0xbc   : > { %1357 = vrot.lane.b32.xlu0 %v1727_v56, %s1839_s20  ;;  %v1253_v22 = vpack.i.b16 %v980_v27, %v946_v54  ;;  %v1242_v59 = vshrl.u32 %v939_v2, 16  ;;  %v1243_v49 = vshrl.u32 %v973_v10, 16  ;;  %v2484_v60 = vcombine.high %v939_v2, %v2656_v1 }
  0xbd   : > { %v2487_v19 = vcombine.high %v973_v10, %v2656_v1  ;;  %v1241_v3 = vpack.i.b16 %v973_v10, %v939_v2  ;;  %v1254_v38 = vshrl.u32 %v946_v54, 16  ;;  %v1255_v51 = vshrl.u32 %v980_v27, 16 }
  0xbe   : > { %v1736_v46 = vcombine.low %v2663_v42, %v1253_v22  ;;  %v1244_v43 = vpack.i.b16 %v1243_v49, %v1242_v59  ;;  %v948_v55 = vcombine.high %v946_v54, %v2656_v1  ;;  %v982_v62 = vcombine.high %v980_v27, %v2656_v1 }
  0xbf   : > { %v566_v29 = vpop.permute.xlu1 %565  ;;  %v564_v14 = vpop.permute.xlu0 %563  ;;  %v1247_v0 = vpack.i.b16 %v2487_v19, %v2484_v60  ;;  %v1256_v2 = vpack.i.b16 %v1255_v51, %v1254_v38  ;;  %v1249_v13 = vshrl.u32 %v2487_v19, 16 }
  0xc0   : > { %1417 = vrot.lane.b32.xlu0 %v1739_v33, %s1840_s21  ;;  %1399 = vrot.lane.b32.xlu1 %v1736_v46, %s1838_s19  ;;  %v1085_v7 = vcombine.low %v554_v53, %v566_v29  ;;  %v1051_v20 = vcombine.low %v552_v8, %v564_v14  ;;  %v1724_v57 = vcombine.low %v2296_v30, %v1244_v43  ;;  %v1213_v30 = vshrl.u32 %v2468_v58, 16 }
  0xc1   : > { %v2507_v53 = vcombine.low %v2665_v5, %v1241_v3  ;;  %v1844_v8 = vmov 0.0   ;;  %v1728_v58 = vcombine.low %v2666_v9, %v1247_v0  ;;  %v1740_v49 = vcombine.low %v2318_v4, %v1256_v2  ;;  %v2672_v3 = vld [vmem:[#allocation5_spill] sm:$0xff]  ;;  %v2678_v9 = vld [vmem:[#allocation11_spill] sm:$0xff] }
  0xc2   : > { %1759 = vmatprep.subr.bf16.mxu0 %v1844_v8  ;;  %v1092_v56 = vrot.slane %v1085_v7, %v1893_v11  ;;  %v1058_v45 = vrot.slane %v1051_v20, %v1893_v11  ;;  %v1214_v59 = vpack.i.b16 %v1213_v30, %v1212_v26  ;;  %v1259_v21 = vpack.i.b16 %v982_v62, %v948_v55  ;;  %v2669_v7 = vld [vmem:[#allocation2_spill] sm:$0xff]  ;;  %v2670_v20 = vld [vmem:[#allocation3_spill] sm:$0xff] }
  0xc3   : > { %v570_v35 = vpop.permute.xlu1 %569  ;;  %v568_v50 = vpop.permute.xlu0 %567  ;;  %v2667_v14 = vpack.i.b16 %v2322_v47, %v2316_v36  ;;  %v1248_v4 = vshrl.u32 %v2484_v60, 16  ;;  %v1261_v31 = vshrl.u32 %v982_v62, 16  ;;  %v2671_v36 = vpack.i.b16 %v2669_v7, %v2670_v20  ;;  %1767 = vmatprep.mubr.msk.bf16.mxu0 %vm1846_vm3, %v1844_v8 }
  0xc4   : > { %v1093_v44 = vcombine.low %v558_v17, %v570_v35  ;;  %v1059_v23 = vcombine.low %v556_v52, %v568_v50  ;;  %1437 = vrot.lane.b32.xlu0 %v1743_v6, %s1841_s22  ;;  %1339 = vrot.lane.b32.xlu1 %v1724_v57, %s1843_s24  ;;  %v1260_v6 = vshrl.u32 %v948_v55, 16  ;;  %v2679_v55 = vld [vmem:[#allocation12_spill] sm:$0xff] }
  0xc5   : > { %v1744_v24 = vcombine.low %v2667_v14, %v1259_v21  ;;  %v1250_v50 = vpack.i.b16 %v1249_v13, %v1248_v4 }
  0xc6   : > { %v1100_v10 = vrot.slane %v1093_v44, %v1893_v11  ;;  %v1066_v34 = vrot.slane %v1059_v23, %v1893_v11  ;;  %v1731_v11 = vcombine.low %v2311_v32, %v1202_v18  ;;  %v1747_v32 = vcombine.low %v2327_v16, %v1214_v59 }
  0xc7   : > { %v2668_v16 = vpack.i.b16 %v2214_v48, %v2223_v61  ;;  %v2673_v48 = vld [vmem:[#allocation6_spill] sm:$0xff]  ;;  %v1262_v26 = vpack.i.b16 %v1261_v31, %v1260_v6 }
  0xc8   : > { %v1101_v17 = vcombine.low %v1092_v56, %v1100_v10  ;;  %v1102_v52 = vcombine.high %v1092_v56, %v1100_v10  ;;  %v1067_v40 = vcombine.low %v1058_v45, %v1066_v34  ;;  %v1068_v22 = vcombine.high %v1058_v45, %v1066_v34  ;;  %1375 = vrot.lane.b32.xlu0 %v1730_v15, %s1845_s25  ;;  %v2674_v15 = vld [vmem:[#allocation8_spill] sm:$0xff]  ;;  %v2675_v56 = vld [vmem:[#allocation7_spill] sm:$0xff] }
  0xc9   : > { %1359 = vrot.lane.b32.xlu1 %v1728_v58, %s1839_s20  ;;  %v1732_v18 = vcombine.low %v2674_v15, %v1250_v50  ;;  %v1748_v58 = vcombine.low %v2678_v9, %v1262_v26 }
  0xca   : > { %v1109_v63 = vrot.slane %v1101_v17, %v1895_v12  ;;  %v1116_v25 = vrot.slane %v1102_v52, %v1895_v12  ;;  %v1075_v54 = vrot.slane %v1067_v40, %v1895_v12  ;;  %v1082_v27 = vrot.slane %v1068_v22, %v1895_v12  ;;  %v2680_v52 = vld [vmem:[#allocation13_spill] sm:$0xff]  ;;  %v2681_v22 = vld [vmem:[#allocation10_spill] sm:$0xff] }
  0xcc   : > { %1377 = vrot.lane.b32.xlu0 %v1731_v11, %s1845_s25  ;;  %v1302_v39 = vshrl.u32 %v1082_v27, 16  ;;  %v1303_v33 = vshrl.u32 %v1116_v25, 16  ;;  %v1301_v42 = vpack.i.b16 %v1116_v25, %v1082_v27  ;;  %v1290_v46 = vshrl.u32 %v1075_v54, 16  ;;  %v2682_v11 = vld [vmem:[#allocation9_spill] sm:$0xff] }
  0xcd   : > { %1419 = vrot.lane.b32.xlu1 %v1740_v49, %s1840_s21  ;;  %v1291_v43 = vshrl.u32 %v1109_v63, 16  ;;  %v1289_v29 = vpack.i.b16 %v1109_v63, %v1075_v54  ;;  %v1083_v60 = vcombine.high %v1075_v54, %v2656_v1  ;;  %v1117_v19 = vcombine.high %v1109_v63, %v2656_v1 }
  0xce   : > { %v1304_v12 = vpack.i.b16 %v1303_v33, %v1302_v39  ;;  %v1737_v47 = vcombine.low %v2671_v36, %v1301_v42  ;;  %v1084_v0 = vcombine.high %v1082_v27, %v2656_v1  ;;  %v1118_v38 = vcombine.high %v1116_v25, %v2656_v1  ;;  %v2676_v1 = vld [vmem:[#allocation4_spill] sm:$0xff] }
  0xcf   : > { %v2540_v28 = vcombine.low %v2668_v16, %v1289_v29  ;;  %v1292_v57 = vpack.i.b16 %v1291_v43, %v1290_v46  ;;  %v1295_v51 = vpack.i.b16 %v1117_v19, %v1083_v60  ;;  %v1296_v44 = vshrl.u32 %v1083_v60, 16 }
  0xd0   : > { %1457 = vrot.lane.b32.xlu0 %v1747_v32, %s1842_s23  ;;  %v1741_v35 = vcombine.low %v2672_v3, %v1304_v12  ;;  %v1297_v23 = vshrl.u32 %v1117_v19, 16  ;;  %v1308_v30 = vshrl.u32 %v1084_v0, 16  ;;  %v1309_v5 = vshrl.u32 %v1118_v38, 16 }
  0xd1   : > { %1439 = vrot.lane.b32.xlu1 %v1744_v24, %s1841_s22  ;;  %v1725_v61 = vcombine.low %v2673_v48, %v1292_v57  ;;  %v2677_v45 = vpack.i.b16 %v2675_v56, %v2676_v1  ;;  %v1307_v17 = vpack.i.b16 %v1118_v38, %v1084_v0  ;;  %v2683_v59 = vpack.i.b16 %v2681_v22, %v2682_v11 }
  0xd2   : > { %v1298_v34 = vpack.i.b16 %v1297_v23, %v1296_v44  ;;  %v1310_v2 = vpack.i.b16 %v1309_v5, %v1308_v30 }
  0xd3   : > { %v1729_v10 = vcombine.low %v2677_v45, %v1295_v51  ;;  %v1745_v63 = vcombine.low %v2683_v59, %v1307_v17 }
  0xd4   : > { %1401 = vrot.lane.b32.xlu0 %v1737_v47, %s1838_s19  ;;  %v1733_v62 = vcombine.low %v2679_v55, %v1298_v34  ;;  %v1749_v40 = vcombine.low %v2680_v52, %v1310_v2 }
  0xd5   : > { %1421 = vrot.lane.b32.xlu1 %v1741_v35, %s1840_s21 }
  0xd8   : > { %1341 = vrot.lane.b32.xlu0 %v1725_v61, %s1843_s24 }
  0xd9   : > { %1379 = vrot.lane.b32.xlu1 %v1732_v18, %s1845_s25 }
  0xdc   : > { %1361 = vrot.lane.b32.xlu0 %v1729_v10, %s1839_s20 }
  0xdd   : > { %1459 = vrot.lane.b32.xlu1 %v1748_v58, %s1842_s23 }
  0xe0   : > { %1381 = vrot.lane.b32.xlu0 %v1733_v62, %s1845_s25 }
  0xe1   : > { %1461 = vrot.lane.b32.xlu1 %v1749_v40, %s1842_s23 }
  0xe4   : > { %1441 = vrot.lane.b32.xlu0 %v1745_v63, %s1841_s22 }
 0x112   : > { %v1396_v25 = vpop.permute.xlu1 %1395 }
 0x116   : > { %v1356_v54 = vpop.permute.xlu1 %1355 }
 0x11a   : > { %v1416_v27 = vpop.permute.xlu1 %1415 }
 0x11e   : > { %v1436_v39 = vpop.permute.xlu1 %1435 }
 0x122   : > { %v1398_v49 = vpop.permute.xlu0 %1397  ;;  %v1456_v32 = vpop.permute.xlu1 %1455 }
 0x126   : > { %v1336_v21 = vpop.permute.xlu0 %1335 }
 0x127   : > { %v1466_v24 = vsel %vm1463_vm4, %v2416_v37, %v1336_v21 }
 0x128   : > { %v1478_v12 = vsel %vm1476_vm5, %v1466_v24, %v1356_v54 }
 0x12a   : > { %v1338_v33 = vpop.permute.xlu0 %1337 }
 0x12b   : > { %v1469_v16 = vsel %vm1463_vm4, %v2451_v41, %v1338_v33 }
 0x12e   : > { %v1358_v42 = vpop.permute.xlu0 %1357 }
 0x12f   : > { %v1480_v37 = vsel %vm1476_vm5, %v1469_v16, %v1358_v42 }
 0x132   : > { %v1418_v46 = vpop.permute.xlu0 %1417  ;;  %v1400_v43 = vpop.permute.xlu1 %1399 }
 0x136   : > { %v1438_v29 = vpop.permute.xlu0 %1437  ;;  %v1340_v14 = vpop.permute.xlu1 %1339 }
 0x137   : > { %v1472_v61 = vsel %vm1463_vm4, %v2507_v53, %v1340_v14 }
 0x13a   : > { %v1376_v4 = vpop.permute.xlu0 %1375 }
 0x13b   : > { %v1487_v13 = vsel %vm1485_vm6, %v1478_v12, %v1376_v4  ;;  %v1360_v6 = vpop.permute.xlu1 %1359 }
 0x13c   : > { %v1496_v31 = vsel %vm1494_vm7, %v1487_v13, %v1396_v25  ;;  %v1482_v44 = vsel %vm1476_vm5, %v1472_v61, %v1360_v6 }
 0x13d   : > { %v1505_v7 = vsel %vm1503_vm8, %v1496_v31, %v1416_v27 }
 0x13e   : > { %v1378_v20 = vpop.permute.xlu0 %1377  ;;  %v1514_v36 = vsel %vm1512_vm9, %v1505_v7, %v1436_v39 }
 0x13f   : > { %v1489_v47 = vsel %vm1485_vm6, %v1480_v37, %v1378_v20  ;;  %v1420_v57 = vpop.permute.xlu1 %1419  ;;  %v1523_v60 = vsel %vm1521_vm10, %v1514_v36, %v1456_v32 }
 0x140   : > { %v1498_v19 = vsel %vm1494_vm7, %v1489_v47, %v1398_v49  ;;  %1760 = vmatpush3.bf16.msra.mxu0 %v1523_v60 }
 0x141   : > { %1761 = vmatprep.subr.bf16.mxu0 %v1844_v8  ;;  %v1507_v3 = vsel %vm1503_vm8, %v1498_v19, %v1418_v46 }
 0x142   : > { %v1458_v41 = vpop.permute.xlu0 %1457  ;;  %v1516_v35 = vsel %vm1512_vm9, %v1507_v3, %v1438_v29 }
 0x143   : > { %v1440_v50 = vpop.permute.xlu1 %1439  ;;  %v1526_v0 = vsel %vm1521_vm10, %v1516_v35, %v1458_v41 }
 0x144   : > { %1762 = vmatpush3.bf16.msra.mxu0 %v1526_v0 }
 0x145   : > { %1763 = vmatprep.subr.bf16.mxu0 %v1844_v8 }
 0x146   : > { %v1402_v38 = vpop.permute.xlu0 %1401 }
 0x147   : > { %v1422_v48 = vpop.permute.xlu1 %1421 }
 0x14a   : > { %v1342_v51 = vpop.permute.xlu0 %1341 }
 0x14b   : > { %v1380_v23 = vpop.permute.xlu1 %1379  ;;  %v1475_v45 = vsel %vm1463_vm4, %v2540_v28, %v1342_v51  ;;  %v1534_v28 = vld [vmem:[%s2628_s1] sm:$0xf] }
 0x14c   : > { %v1491_v15 = vsel %vm1485_vm6, %v1482_v44, %v1380_v23 }
 0x14d   : > { %v1500_v18 = vsel %vm1494_vm7, %v1491_v15, %v1400_v43 }
 0x14e   : > { %v1362_v26 = vpop.permute.xlu0 %1361  ;;  %v1509_v30 = vsel %vm1503_vm8, %v1500_v18, %v1420_v57 }
 0x14f   : > { %v1460_v5 = vpop.permute.xlu1 %1459  ;;  %v1518_v56 = vsel %vm1512_vm9, %v1509_v30, %v1440_v50  ;;  %v1484_v53 = vsel %vm1476_vm5, %v1475_v45, %v1362_v26 }
 0x150   : > { %v1529_v1 = vsel %vm1521_vm10, %v1518_v56, %v1460_v5 }
 0x151   : > { %1764 = vmatpush3.bf16.msra.mxu0 %v1529_v1 }
 0x152   : > { %v1382_v10 = vpop.permute.xlu0 %1381  ;;  %1765 = vmatprep.subr.bf16.mxu0 %v1844_v8 }
 0x153   : > { %v1493_v34 = vsel %vm1485_vm6, %v1484_v53, %v1382_v10  ;;  %v1462_v55 = vpop.permute.xlu1 %1461 }
 0x154   : > { %v1502_v9 = vsel %vm1494_vm7, %v1493_v34, %v1402_v38 }
 0x155   : > { %v1511_v58 = vsel %vm1503_vm8, %v1502_v9, %v1422_v48 }
 0x156   : > { %v1442_v2 = vpop.permute.xlu0 %1441 }
 0x157   : > { %v1520_v62 = vsel %vm1512_vm9, %v1511_v58, %v1442_v2 }
 0x158   : > { %v1532_v17 = vsel %vm1521_vm10, %v1520_v62, %v1462_v55 }
 0x159   : > { %1766 = vmatpush3.bf16.msra.mxu0 %v1532_v17 }
 0x15c   : > { %1768 = vmatmul.mubr.msk.bf16.vlgmr.msra.gmra.mrb[0].mxu0 %vm1535_vm11, %v1534_v28 }
 0x22f   : > { %v1573_v8 = vpop.f32.mrb[0].mxu0 }
 0x230   : > { %v1769_v52 = vpop.f32.mrb[1].mxu0  ;;  %v1579_v40 = vsel %vm1535_vm11, %v1573_v8, 0.0 }
 0x231   : > { %1580 = vadd.xlane.f32.xlu0 %v1579_v40  ;;  %v1576_v22 = vpop.f32.mrb[2].mxu0 }
 0x232   : > { %v1770_v11 = vpop.f32.mrb[3].mxu0 }
 0x2be   : > { %v1581_v59 = vpop.xlane.xlu0 %1580 }
 0x2bf   : > { %v1583_v63 = vmul.f32 0.015625, %v1581_v59 }
 0x2c1   : > { %v1584_v25 = vsub.f32 %v1573_v8, %v1583_v63 }
 0x2c3   : > { %v1585_v54 = vmul.f32 %v1584_v25, %v1584_v25 }
 0x2c5   : > { %v1586_v27 = vsel %vm1535_vm11, %v1585_v54, 0.0 }
 0x2c6   : > { %1587 = vadd.xlane.f32.xlu1 %v1586_v27 }
 0x353   : > { %v1588_v49 = vpop.xlane.xlu1 %1587 }
 0x354   : > { %v1589_v21 = vmul.f32 0.015625, %v1588_v49 }
 0x356   : > { %v1590_v39 = vadd.f32 1e-05, %v1589_v21 }
 0x358   : > { %1808 = vrsqrt.f32 %v1590_v39 }
 0x362   : > { %v1809_v33 = vpop.eup %1808 }
 0x363   : > { %v1592_v32 = vmul.f32 %v1809_v33, %v1584_v25 }
 0x365   : > { %vm1593_vm12 = vcmp.ge.f32.partialorder %v1592_v32, 0.0  ;;  %v1594_v42 = vmul.f32 0.2, %v1592_v32 }
 0x367   : > { %v1595_v46 = vsel %vm1593_vm12, %v1592_v32, %v1594_v42 }
 0x368   : > { %1596 = vst.msk [vmem:[%s183_s3] sm:$0xff] %vm1535_vm11, %v1595_v46 }
 0x369 PF: > { %s12_s11 = sadd.s32 1, %s1832_s11   ;;  %s2684_s9 = smov %s1828_s10 }
 0x36a   : > { %p9_p6 = scmp.ge.s32.totalorder %s12_s11, 4   ;;  %s2685_s10 = smov %s2687_s12 }
 0x36c   :  { %11 = sbr.rel (!%p9_p6) target bundleno = 2 (0x2), region = 64 }

</bundles_post_ra>
